<compile_context>
chip_gen: v7x
topology: tpu7x:2x2x1
jax: 0.10.0
libtpu: 0.0.40
codegen_flags: <defaults>
</compile_context>

<pallas_src>
import jax
import jax.numpy as jnp
from jax.experimental import pallas as pl
from jax.experimental.pallas import tpu as pltpu
import math


def make_pe_table(d_model: int, max_len: int) -> jnp.ndarray:
    """Deterministic sinusoidal table, identical to the PyTorch __init__ (fp32)."""
    position = jnp.arange(0, max_len, dtype=jnp.float32)[:, None]            # (L, 1)
    div_term = jnp.exp(
        jnp.arange(0, d_model, 2, dtype=jnp.float32)
        * (-math.log(10000.0) / d_model)
    )                                                                         # (D/2,)
    pe = jnp.zeros((max_len, d_model), dtype=jnp.float32)
    pe = pe.at[:, 0::2].set(jnp.sin(position * div_term))
    pe = pe.at[:, 1::2].set(jnp.cos(position * div_term))
    # pe.unsqueeze(0).transpose(0, 1) -> (max_len, 1, d_model)
    return pe[:, None, :]


def _round_up(n: int, m: int) -> int:
    return ((n + m - 1) // m) * m


def _vmem_capacity_bytes() -> int:
    try:
        return int(pltpu.get_tpu_info().vmem_capacity_bytes)
    except Exception:
        return 64 << 20   # conservative fallback: v7x per-TensorCore VMEM


def _plan_tiles(S: int, BD: int, D: int, max_len: int, dtype, block_rows=None):
    """Pick the S-tile row count and an explicit VMEM limit, per dtype and TPU generation."""
    itemsize = jnp.dtype(dtype).itemsize
    row_align = max(8, 32 // itemsize)                 # sublane packing: f32->8, bf16->16, int8->32
    lane_x = _round_up(BD, 128) * itemsize             # padded bytes per x/out row in VMEM
    lane_f32 = _round_up(BD, 128) * 4                  # padded bytes per fp32 intermediate row
    per_row = 4 * lane_x + 2 * lane_f32                # double-buffered (x + out) + fp32 temps
    pe_vmem = 2 * _round_up(max_len, 8) * _round_up(D, 128) * 4   # resident pe table (x2 safety)

    vmem = _vmem_capacity_bytes()
    usable = max(int(0.70 * vmem) - pe_vmem - (4 << 20), per_row * row_align)
    t = max(row_align, (usable // per_row) // row_align * row_align)
    # >= ~1-4 MiB of real data per block already reaches ~85% of the HBM roofline;
    # cap at ~8 MiB of real data so v7x (64 MiB VMEM) keeps double-buffering headroom.
    t = min(t, max(row_align, ((8 << 20) // max(BD * itemsize, 1)) // row_align * row_align))

    S_pad = _round_up(S, row_align)
    if S_pad > row_align:
        # Keep the grid >= 2 so the "parallel" S axis can be sharded across both v7x cores.
        t = min(t, max(row_align, _round_up((S + 1) // 2, row_align)))
    t = min(t, S_pad)

    if block_rows is not None:                          # explicit override (tests / tuning)
        t = min(_round_up(max(int(block_rows), 1), row_align), S_pad)

    vmem_limit = int(min(vmem, max(32 << 20, pe_vmem + per_row * t + (8 << 20))))
    return t, vmem_limit


def _pos_enc_kernel(off_ref, x_ref, pe_ref, o_ref):
    # off_ref: (1,) int32 in SMEM (scalar prefetch).
    # x_ref/o_ref: (tS, B*D) lane-dense tile.  pe_ref: full (max_len, D) fp32 table,
    # resident in VMEM (constant index_map -> fetched once per call).
    tS, BD = x_ref.shape
    max_len, D = pe_ref.shape
    B = BD // D

    # pe rows for this tile: [offset + i*tS, offset + (i+1)*tS).  The clamp only matters for
    # the padded tail tile, whose corresponding x rows are never written back anyway.
    start = jnp.clip(off_ref[0] + pl.program_id(0) * tS, 0, max(max_len - tS, 0))
    pe_tile = pe_ref[pl.ds(start, tS), :].astype(jnp.float32)          # (tS, D)
    pe_row = jnp.tile(pe_tile, (1, B)) if B > 1 else pe_tile           # (tS, B*D) lane repeat

    # fp32 add (matches the PyTorch fp32 pe buffer promotion); cast only at the final store.
    o_ref[...] = (x_ref[...].astype(jnp.float32) + pe_row).astype(o_ref.dtype)


def positional_encoding(x: jnp.ndarray, pe: jnp.ndarray, offset=0, *,
                        block_rows: int | None = None,
                        donate_x: bool = False) -> jnp.ndarray:
    """x: (S, B, D); pe: (max_len, 1, D) or (max_len, D), fp32.
    Returns x + pe[offset : offset + S] broadcast over the batch dim, in x.dtype."""
    S, B, D = x.shape
    max_len = pe.shape[0]
    pe2 = pe.reshape(max_len, -1)                      # (max_len, D) -- free reshape, stays fp32
    if pe2.shape[-1] != D:
        raise ValueError(f"pe last dim {pe2.shape[-1]} does not match d_model {D}")
    if isinstance(offset, int) and not (0 <= offset and offset + S <= max_len):
        raise ValueError(f"offset + seq_len = {offset + S} exceeds max_len = {max_len}")

    BD = B * D
    x2 = x.reshape(S, BD)                              # free contiguous reshape -> lane-dense slab
    off_arr = jnp.full((1,), offset, dtype=jnp.int32)

    t, vmem_limit = _plan_tiles(S, BD, D, max_len, x.dtype, block_rows)
    grid = (pl.cdiv(S, t),)

    out2 = pl.pallas_call(
        _pos_enc_kernel,
        out_shape=jax.ShapeDtypeStruct((S, BD), x.dtype),
        grid_spec=pltpu.PrefetchScalarGridSpec(
            num_scalar_prefetch=1,                     # `offset` lives in SMEM
            grid=grid,
            in_specs=[
                # x tile.  (index_maps receive the scalar-prefetch ref as a trailing arg.)
                # TODO(synk): bump to pipeline_mode=pl.Buffered(3) if xprof still shows exposed
                # input DMA on v7x after the layout fix.
                pl.BlockSpec((t, BD), lambda i, off: (i, 0)),
                # Full pe table; constant block index -> resident in VMEM, DMA'd once per call.
                pl.BlockSpec((max_len, D), lambda i, off: (0, 0)),
            ],
            out_specs=pl.BlockSpec((t, BD), lambda i, off: (i, 0)),
        ),
        compiler_params=pltpu.CompilerParams(
            dimension_semantics=("parallel",),         # independent S tiles -> megacore-shardable
            vmem_limit_bytes=vmem_limit,
        ),
        # Operands are (offset, x2, pe2): aliasing x2 (index 1) with the output lets a donated
        # x be updated in place (no second (S, B, D) HBM buffer).
        input_output_aliases=({1: 0} if donate_x else {}),
    )(off_arr, x2, pe2)

    return out2.reshape(S, B, D)                       # free reshape back to the module layout


if __name__ == "__main__":
    seq_len, batch, d_model, max_len = 8, 2, 32, 64

    root = jax.random.PRNGKey(0)
    k0, k1, k2 = jax.random.split(root, 3)
    pe = make_pe_table(d_model, max_len)               # (max_len, 1, d_model), fp32

    # Basic forward (offset=0).
    x = jax.random.normal(k0, (seq_len, batch, d_model), dtype=jnp.float32)
    out = jax.block_until_ready(positional_encoding(x, pe, offset=0))
    ref = x + pe[0:seq_len]
    assert out.shape == (seq_len, batch, d_model)
    assert jnp.allclose(out, ref, atol=1e-6), "mismatch vs reference (offset=0)"

    # Non-zero (runtime scalar-prefetched) offset.
    out_off = jax.block_until_ready(positional_encoding(x, pe, offset=5))
    ref_off = x + pe[5:5 + seq_len]
    assert jnp.allclose(out_off, ref_off, atol=1e-6), "mismatch vs reference (offset=5)"

    # Multi-tile pipelined path (grid=2) with a forced small block and an offset that is not a
    # multiple of the tile size (exercises the unaligned in-kernel pe window per tile).
    S2 = 32
    x2 = jax.random.normal(k1, (S2, batch, d_model), dtype=jnp.float32)
    out2 = jax.block_until_ready(positional_encoding(x2, pe, offset=3, block_rows=16))
    ref2 = x2 + pe[3:3 + S2]
    assert jnp.allclose(out2, ref2, atol=1e-6), "mismatch vs reference (multi-tile)"

    # bf16 activations: fp32 add in-kernel, cast only at the output store.
    S3 = 16
    x3 = jax.random.normal(k2, (S3, batch, d_model), dtype=jnp.float32).astype(jnp.bfloat16)
    out3 = jax.block_until_ready(positional_encoding(x3, pe, offset=2))
    ref3 = (x3.astype(jnp.float32) + pe[2:2 + S3]).astype(jnp.bfloat16)
    assert jnp.allclose(out3.astype(jnp.float32), ref3.astype(jnp.float32), atol=2e-2), \
        "mismatch vs reference (bf16)"

    print("KERNEL_OK")
</pallas_src>

<mosaic_0001>
module attributes {stable_mosaic.version = 11 : i64} {
  func.func @_pos_enc_kernel(%arg0: i32, %arg1: memref<1xi32, #tpu.memory_space<smem>>, %arg2: memref<8x64xf32, #tpu.memory_space<vmem>>, %arg3: memref<64x32xf32, #tpu.memory_space<vmem>>, %arg4: memref<8x64xf32, #tpu.memory_space<vmem>>) attributes {dimension_semantics = [#tpu.dimension_semantics<parallel>], iteration_bounds = array<i64: 1>, scalar_prefetch = 1 : i64, scratch_operands = 0 : i64, tpu.core_type = #tpu.core_type<tc>, window_params = [{transform_indices = @transform_0, window_bounds = array<i64: 8, 64>}, {pipeline_mode = #tpu.pipeline_mode<synchronous>, transform_indices = @transform_1, window_bounds = array<i64: 64, 32>}, {transform_indices = @transform_2, window_bounds = array<i64: 8, 64>}]} {
    %c0 = arith.constant 0 : index
    %0 = memref.load %arg1[%c0] : memref<1xi32, #tpu.memory_space<smem>>
    %c8_i32 = arith.constant 8 : i32
    %1 = arith.muli %arg0, %c8_i32 : i32
    %2 = arith.addi %0, %1 : i32
    %c0_i32 = arith.constant 0 : i32
    %c56_i32 = arith.constant 56 : i32
    %3 = arith.maxsi %c0_i32, %2 : i32
    %4 = arith.minsi %c56_i32, %3 : i32
    %5 = arith.index_cast %4 : i32 to index
    %c0_0 = arith.constant 0 : index
    %6 = vector.load %arg3[%5, %c0_0] : memref<64x32xf32, #tpu.memory_space<vmem>>, vector<8x32xf32>
    %7 = tpu.concatenate %6, %6 in 1 : vector<8x32xf32>, vector<8x32xf32> -> vector<8x64xf32>
    %c0_1 = arith.constant 0 : index
    %c0_2 = arith.constant 0 : index
    %8 = vector.load %arg2[%c0_1, %c0_2] : memref<8x64xf32, #tpu.memory_space<vmem>>, vector<8x64xf32>
    %9 = arith.addf %8, %7 : vector<8x64xf32>
    %c0_3 = arith.constant 0 : index
    %c0_4 = arith.constant 0 : index
    %10 = vector.load %arg4[%c0_3, %c0_4] : memref<8x64xf32, #tpu.memory_space<vmem>>, vector<8x64xf32>
    tpu.vector_store %arg4[%c0_3, %c0_4], %9 {strides = array<i32>} : memref<8x64xf32, #tpu.memory_space<vmem>>, vector<8x64xf32>,
    return
  }
  func.func @transform_0(%arg0: i32, %arg1: memref<1xi32, #tpu.memory_space<smem>>) -> (i32, i32) {
    %c0_i32 = arith.constant 0 : i32
    %c0_i32_0 = arith.constant 0 : i32
    return %arg0, %c0_i32 : i32, i32
  }
  func.func @transform_1(%arg0: i32, %arg1: memref<1xi32, #tpu.memory_space<smem>>) -> (i32, i32) {
    %c0_i32 = arith.constant 0 : i32
    %c0_i32_0 = arith.constant 0 : i32
    %c0_i32_1 = arith.constant 0 : i32
    return %c0_i32, %c0_i32_0 : i32, i32
  }
  func.func @transform_2(%arg0: i32, %arg1: memref<1xi32, #tpu.memory_space<smem>>) -> (i32, i32) {
    %c0_i32 = arith.constant 0 : i32
    %c0_i32_0 = arith.constant 0 : i32
    return %arg0, %c0_i32 : i32, i32
  }
}

</mosaic_0001>

<bundles_post_ra>
// kernel: tpu_custom_call.1
= control target key start
LH: loop header
LB: loop body
LE: loop exit
PB: predicated region body
PF: predicated region fallthrough
CT: control target
= control target key end

     0   :  { %s130_s0 = inlined_call_operand.<no memory space> [shape: s32[1], index: 0, kind: input, shape index: {}]   ;;  %s131_s1 = inlined_call_operand.vmem [shape: f32[8,64], index: 1, kind: input, shape index: {}]   ;;  %s132_s2 = inlined_call_operand.vmem [shape: f32[64,32], index: 2, kind: input, shape index: {}]   ;;  %s133_s3 = inlined_call_operand.hbm [shape: f32[8,64], index: 3, kind: output, shape index: {}]  }
   0x1   :  { %p17_p0 = scmp.gt.s32.totalorder %s130_s0, 0  ;;  %p48_p1 = scmp.lt.s32.totalorder %s130_s0, 56 }
   0x2   :  { %9 = vsyncpa [#allocation5], 0  ;;  %s81_s21 = smov 32   ;;  %vm27_vm0 = vcmask 261120   ;;  %v29_v1 = vld [vmem:[%s131_s1] sm:$0xff]  ;;  %s82_s24 = smov [#allocation4]  }
   0x3   :  { %s135_s0 = smov (!%p17_p0, %s130_s0), 0  ;;  %s39_s25 = sshll.u32 %s82_s24, 4  ;;  %vm31_vm1 = vcmask 523264   ;;  %s40_s25 = int_to_ptr.vmem [resolvable:$true] %s39_s25 }
   0x4   :  { %s137_s0 = smov (!%p48_p1, %s135_s0), 56  ;;  %s57_s26 = scalar_lea.vmem %s40_s25, 128 }
   0x5   :  { %s21_s20 = scalar_lea.vmem %s132_s2, %s137_s0  ;;  %p58_p2 = scmp.ne.s32.totalorder %s40_s25, %s57_s26 }
   0x6   :  { %v22_v0 = vld [vmem:[%s21_s20] sm:$0xff]  ;;  %p62_p3 = scmp.lt.s32.totalorder %s40_s25, %s40_s25  ;;  %p63_p4 = scmp.lt.s32.totalorder %s57_s26, %s57_s26 }
   0x7   :  { %24 = vrot.lane.b32.xlu0 %v22_v0, %s81_s21 }
   0x8   :  { %p64_p5 = por %p63_p4, %p62_p3 }
   0xa   :  { %p65_p6 = pnand %p64_p5, %p58_p2 }
  0x79   :  { %v25_v2 = vpop.permute.xlu0 %24 }
  0x7a   :  { %v28_v3 = vsel %vm27_vm0, %v22_v0, %v25_v2 }
  0x7b   :  { %v30_v4 = vadd.f32 %v29_v1, %v28_v3 }
  0x7d   :  { %32 = vst.msk [vmem:[#allocation4] sm:$0xff] %vm31_vm1, %v30_v4 }
  0x7e   :  { %68 = shalt.err (!%p65_p6)
}
  0x7f   :  { %s69_s27 = scalar_lea.hbm %s133_s3, 128 }
  0x80   :  { %p70_p7 = scmp.ne.s32.totalorder %s133_s3, %s69_s27  ;;  %p73_p8 = scmp.lt.u32.totalorder %s69_s27, %s133_s3 }
  0x82   :  { %p75_p9 = pnand %p73_p8, %p70_p7 }
  0x84   :  { %78 = shalt.err (!%p75_p9)
}
  0x85   :  { %42 = dma.vmem_to_hbm [thread:$0]  %s40_s25, 128, %s133_s3, [#allocation5]  }
  0x86   :  { %79 = dma.done.wait [#allocation5], 128  }
  0x87   :  { %80 = vsyncadd [#allocation5], 4294967168 }
  0x88   :  { %46 = vsyncpa [#allocation5], 1 }

</bundles_post_ra>
